<compile_context>
chip_gen: v5e
topology: v5e:2x2
jax: 0.10.0
libtpu: 0.0.40
codegen_flags: <defaults>
</compile_context>

<pallas_src>
import jax
import jax.numpy as jnp
from jax.experimental import pallas as pl
from jax.experimental.pallas import tpu as pltpu


def _round_up(x: int, m: int) -> int:
    return ((x + m - 1) // m) * m


# --------------------------------------------------------------------------
# Small-problem fast path: whole problem in one kernel invocation (no grid).
# --------------------------------------------------------------------------
def _linear_small_kernel(x_ref, wt_ref, b_ref, o_ref):
    # x_ref: (B, F), wt_ref: (F, C), b_ref: (1, C), o_ref: (B, C)
    o_ref[...] = (
        jnp.dot(x_ref[...], wt_ref[...], preferred_element_type=jnp.float32)
        + b_ref[...]
    ).astype(o_ref.dtype)


# --------------------------------------------------------------------------
# Tiled path: grid = (B/tm, C/tn, F/tk), reduction axis last.
# --------------------------------------------------------------------------
def _linear_tiled_kernel(x_ref, wt_ref, b_ref, o_ref):
    # x_ref:  (tm, tk)  activations, compute dtype (bf16 by default)
    # wt_ref: (tk, tn)  pre-transposed weight (F, C layout), compute dtype
    # b_ref:  (1, tn)   bias, f32
    # o_ref:  (tm, tn)  f32 output; also the accumulator — the output block is
    #                   resident across the k reduction axis.
    k = pl.program_id(2)

    @pl.when(k == 0)
    def _():
        o_ref[...] = jnp.zeros_like(o_ref)

    o_ref[...] += jnp.dot(
        x_ref[...], wt_ref[...], preferred_element_type=jnp.float32
    )

    @pl.when(k == pl.num_programs(2) - 1)
    def _():
        # Bias is added exactly once, on the final reduction step.
        o_ref[...] += b_ref[...]


def prepare_classifier_params(weight, bias, *, tn, tk, compute_dtype=jnp.bfloat16):
    """One-time (init-time) parameter transform.

    Transposes the torch-layout weight (C, F) -> (F, C), zero-pads to tile
    multiples and casts to the MXU compute dtype, so the per-call forward
    streams the weight directly with no relayout or pad copies on the hot path.
    """
    C, F = weight.shape
    Fp, Cp = _round_up(F, tk), _round_up(C, tn)
    wt = weight.T  # (F, C)
    if (Fp, Cp) != (F, C):
        wt = jnp.pad(wt, ((0, Fp - F), (0, Cp - C)))
    wt = wt.astype(compute_dtype)
    b2 = bias
    if Cp != C:
        b2 = jnp.pad(b2, (0, Cp - C))
    b2 = b2.reshape(1, Cp).astype(jnp.float32)
    return wt, b2


def classifier_forward(
    x,
    weight,
    bias,
    *,
    tm=None,
    tn=None,
    tk=None,
    compute_dtype=jnp.bfloat16,
    small_path_elems=1 << 20,
):
    """Forward pass of Classifier (linear type): y = x @ W.T + b.

    x:      (B, F) float32
    weight: (C, F) float32  (torch nn.Linear convention)
    bias:   (C,)   float32
    returns (B, C) float32
    """
    B, F = x.shape
    C = weight.shape[0]

    # ---- small-problem fast path: single invocation, f32, no padding -------
    if B * F + F * C + B * C <= small_path_elems:
        return pl.pallas_call(
            _linear_small_kernel,
            out_shape=jax.ShapeDtypeStruct((B, C), jnp.float32),
        )(
            x.astype(jnp.float32),
            weight.T.astype(jnp.float32),
            bias.reshape(1, C).astype(jnp.float32),
        )

    # ---- tiled path ---------------------------------------------------------
    # tm: multiple of 8 (prefer >=256 to fill the 2x256^2 MXU on v6e/v7x and
    # to cut weight re-streaming); tn/tk: multiples of 128 (prefer 256+).
    tm = tm if tm is not None else min(512, _round_up(B, 8))
    tn = tn if tn is not None else min(1024, _round_up(C, 128))
    tk = tk if tk is not None else min(1024, _round_up(F, 128))

    # NOTE: for production, call prepare_classifier_params once at init time
    # and pass the prepared (wt, b2) in; doing it per call re-pads the weight.
    wt, b2 = prepare_classifier_params(
        weight, bias, tn=tn, tk=tk, compute_dtype=compute_dtype
    )
    Fp, Cp = wt.shape
    Bp = _round_up(B, tm)

    xp = x
    if (Bp, Fp) != (B, F):
        xp = jnp.pad(x, ((0, Bp - B), (0, Fp - F)))
    xp = xp.astype(compute_dtype)

    grid = (Bp // tm, Cp // tn, Fp // tk)
    itemsize = jnp.dtype(compute_dtype).itemsize
    # Real streamed traffic: x is re-read per class tile, weight per batch tile.
    bytes_accessed = (
        itemsize * (Cp // tn) * Bp * Fp
        + itemsize * (Bp // tm) * Cp * Fp
        + 4 * Bp * Cp
    )

    out_padded = pl.pallas_call(
        _linear_tiled_kernel,
        out_shape=jax.ShapeDtypeStruct((Bp, Cp), jnp.float32),
        grid=grid,
        in_specs=[
            pl.BlockSpec((tm, tk), lambda i, j, k: (i, k)),  # x
            pl.BlockSpec((tk, tn), lambda i, j, k: (k, j)),  # weight (F, C)
            pl.BlockSpec((1, tn), lambda i, j, k: (0, j)),   # bias
        ],
        out_specs=pl.BlockSpec((tm, tn), lambda i, j, k: (i, j)),
        compiler_params=pltpu.CompilerParams(
            dimension_semantics=("parallel", "parallel", "arbitrary"),
            # Budgeted for v7x (64 MiB/TC); generous for v5e/v6e as well.
            vmem_limit_bytes=48 * 1024 * 1024,
        ),
        cost_estimate=pl.CostEstimate(
            flops=2 * Bp * Fp * Cp,
            transcendentals=0,
            bytes_accessed=bytes_accessed,
        ),
    )(xp, wt, b2)

    if (Bp, Cp) != (B, C):
        out_padded = out_padded[:B, :C]
    return out_padded


def init_classifier_params(key, feature_dim, class_num):
    """Deterministic init matching init_weights for nn.Linear:
    xavier_normal_(weight), zeros_(bias)."""
    std = (2.0 / (feature_dim + class_num)) ** 0.5
    weight = std * jax.random.normal(key, (class_num, feature_dim), jnp.float32)
    bias = jnp.zeros((class_num,), jnp.float32)
    return weight, bias


# TODO(synk): the type='wn' (weight_norm) variant is not implemented; only the
# default 'linear' path of Classifier is covered.


if __name__ == "__main__":
    key = jax.random.PRNGKey(0)
    k_w, k_x, k_w2, k_x2 = jax.random.split(key, 4)

    # ---- module-consistent small shapes (small fast path) -------------------
    feature_dim, class_num, batch = 32, 16, 8
    weight, bias = init_classifier_params(k_w, feature_dim, class_num)
    x = jax.random.normal(k_x, (batch, feature_dim), jnp.float32)

    fwd = jax.jit(classifier_forward)
    out = jax.block_until_ready(fwd(x, weight, bias))
    ref = x @ weight.T + bias
    assert out.shape == (batch, class_num)
    assert jnp.allclose(out, ref, atol=1e-5, rtol=1e-5)

    # ---- exercise the tiled bf16 path (odd dims -> padding, multi-step k) ---
    F2, C2, B2 = 600, 200, 100
    weight2, bias2 = init_classifier_params(k_w2, F2, C2)
    x2 = jax.random.normal(k_x2, (B2, F2), jnp.float32)

    fwd_tiled = jax.jit(
        lambda a, w, b: classifier_forward(
            a, w, b, tm=64, tn=128, tk=256, small_path_elems=0
        )
    )
    out2 = jax.block_until_ready(fwd_tiled(x2, weight2, bias2))
    ref2 = x2 @ weight2.T + bias2
    assert out2.shape == (B2, C2)
    # bf16 inputs with f32 accumulation: loosened tolerance vs f32 reference.
    assert jnp.allclose(out2, ref2, atol=5e-2, rtol=5e-2)

    print("KERNEL_OK")
</pallas_src>

<mosaic_0001>
module attributes {stable_mosaic.version = 11 : i64} {
  func.func @_linear_small_kernel(%arg0: memref<8x32xf32, #tpu.memory_space<vmem>>, %arg1: memref<32x16xf32, #tpu.memory_space<vmem>>, %arg2: memref<1x16xf32, #tpu.memory_space<vmem>>, %arg3: memref<8x16xf32, #tpu.memory_space<vmem>>) attributes {dimension_semantics = [], scalar_prefetch = 0 : i64, scratch_operands = 0 : i64, tpu.core_type = #tpu.core_type<tc>} {
    %c0 = arith.constant 0 : index
    %c0_0 = arith.constant 0 : index
    %0 = vector.load %arg0[%c0, %c0_0] : memref<8x32xf32, #tpu.memory_space<vmem>>, vector<8x32xf32>
    %c0_1 = arith.constant 0 : index
    %c0_2 = arith.constant 0 : index
    %1 = vector.load %arg1[%c0_1, %c0_2] : memref<32x16xf32, #tpu.memory_space<vmem>>, vector<32x16xf32>
    %cst = arith.constant dense<0.000000e+00> : vector<8x16xf32>
    %2 = tpu.matmul %0, %1, %cst {dimension_numbers = #tpu.dot_dimension_numbers<[1], [0], [0], [1], [0, 0, 1, 1], [], []>} : vector<8x32xf32>, vector<32x16xf32>, vector<8x16xf32> -> vector<8x16xf32>
    %c0_3 = arith.constant 0 : index
    %c0_4 = arith.constant 0 : index
    %3 = vector.load %arg2[%c0_3, %c0_4] : memref<1x16xf32, #tpu.memory_space<vmem>>, vector<1x16xf32>
    %4 = vector.broadcast %3 : vector<1x16xf32> to vector<8x16xf32>
    %5 = arith.addf %2, %4 : vector<8x16xf32>
    %c0_5 = arith.constant 0 : index
    %c0_6 = arith.constant 0 : index
    %6 = vector.load %arg3[%c0_5, %c0_6] : memref<8x16xf32, #tpu.memory_space<vmem>>, vector<8x16xf32>
    tpu.vector_store %arg3[%c0_5, %c0_6], %5 {strides = array<i32>} : memref<8x16xf32, #tpu.memory_space<vmem>>, vector<8x16xf32>,
    return
  }
}

</mosaic_0001>

<bundles_post_ra>
// kernel: classifier_forward.1
= control target key start
LH: loop header
LB: loop body
LE: loop exit
PB: predicated region body
PF: predicated region fallthrough
CT: control target
= control target key end

     0   :  { %s137_s0 = inlined_call_operand.vmem [shape: f32[8,32], index: 0, kind: input, shape index: {}]   ;;  %s138_s1 = inlined_call_operand.vmem [shape: f32[32,16], index: 1, kind: input, shape index: {}]   ;;  %s139_s2 = inlined_call_operand.vmem [shape: f32[1,16], index: 2, kind: input, shape index: {}]   ;;  %s140_s3 = inlined_call_operand.hbm [shape: f32[8,16], index: 3, kind: output, shape index: {}]  }
   0x1   :  { %v19_v0 = vld [vmem:[%s138_s1 + $0x18] sm:$0xff]  ;;  %v18_v1 = vld [vmem:[%s138_s1 + $0x10] sm:$0xff]  ;;  %v17_v2 = vld [vmem:[%s138_s1 + $0x8] sm:$0xff] }
   0x2   :  { %40 = vmatpush.msra.mxu0 %v19_v0 }
   0x3   :  { %8 = vsyncpa [#allocation3], 0  ;;  %v16_v3 = vld [vmem:[%s138_s1] sm:$0xff]  ;;  %vm24_vm0 = vcmask 261120   ;;  %s95_s24 = smov [#allocation2]   ;;  %s57_s28 = sshll.u32 %s140_s3, 4  ;;  %s58_s28 = int_to_ptr.hbm [resolvable:$true] %s57_s28 }
   0x4   :  { %41 = vmatpush.msra.mxu0 %v18_v1  ;;  %v15_v4 = vld [vmem:[%s137_s0] sm:$0xff]  ;;  %s55_s25 = sshll.u32 %s95_s24, 4  ;;  %vm48_vm1 = vcmask 130048   ;;  %s56_s25 = int_to_ptr.vmem [resolvable:$true] %s55_s25 }
   0x5   :  { %v68_v5 = vld [vmem:[%s139_s2] ss:$0 sm:$0xff] }
   0x6   :  { %42 = vmatpush.msra.mxu0 %v17_v2 }
   0x8   :  { %43 = vmatpush.msra.mxu0 %v16_v3 }
   0x9   :  { %66 = vmatmul.msk.f32.vlgmr.msra.gmra.mxu0 %vm24_vm0, %v15_v4 }
  0x86   :  { %v45_v6 = vpop.f32.mrf.mxu0 }
  0x87   :  { %v46_v7 = vadd.f32 %v68_v5, %v45_v6 }
  0x89   :  { %49 = vst.msk [vmem:[#allocation2] sm:$0xff] %vm48_vm1, %v46_v7 }
  0x8a   :  { %60 = dma.vmem_to_hbm [thread:$0]  %s56_s25, 128, %s58_s28, [#allocation3]  }
  0x8b   :  { %93 = dma.done.wait [#allocation3], 128  }
  0x8c   :  { %94 = vsyncadd [#allocation3], 4294967168 }
  0x8d   :  { %65 = vsyncpa [#allocation3], 1 }

</bundles_post_ra>
